<compile_context>
chip_gen: v6e
topology: v6e:2x2x1
jax: 0.10.0
libtpu: 0.0.40
codegen_flags: <defaults>
</compile_context>

<pallas_src>
import functools
import math

import numpy as np

import jax
import jax.numpy as jnp
from jax.experimental import pallas as pl
from jax.experimental.pallas import tpu as pltpu

_LANE = 128
_MIB = 1024 * 1024


def _round_up(x, m):
    return pl.cdiv(x, m) * m


def _vmem_limit_bytes():
    """Per-generation scoped-VMEM budget.

    v7x: 64 MiB physical  -> ~48 MiB budget.
    v5e/v6e: 128 MiB      -> ~96 MiB budget.
    Budget must cover 2x adj tile + support (resident or 2x streamed tile)
    + output tile (+ f32 scratch when the output dtype is narrower than f32).
    """
    try:
        phys = int(pltpu.get_tpu_info().vmem_capacity_bytes)
        return int(min(96 * _MIB, max(32 * _MIB, (phys * 3) // 4)))
    except Exception:
        return 48 * _MIB


def _pick_tile(n, max_tile):
    """Largest multiple of 128 (<= max_tile) that minimizes padding of n.

    Ties go to the larger tile (also prefers 256-multiples on v6e/v7x where
    the MXU is 2x256^2); per-grid-step overhead makes big tiles win once the
    padding cost is equal.
    """
    best_t, best_pad = _LANE, _round_up(n, _LANE)
    t = _LANE
    while t <= max_tile:
        pad = _round_up(n, t)
        if pad < best_pad or (pad == best_pad and t > best_t):
            best_t, best_pad = t, pad
        t += _LANE
    return best_t


# ---------------------- Stage 1: support = X @ W (producer) -----------------

def _support_kernel(x_ref, w_ref, o_ref, *, precision):
    o_ref[...] = jnp.dot(
        x_ref[...], w_ref[...],
        preferred_element_type=jnp.float32,
        precision=precision,
    ).astype(o_ref.dtype)


def _compute_support(x_in, w_in, *, row_tile, out_dtype, vmem_limit, precision):
    n_pad, f_in = x_in.shape
    f_out_pad = w_in.shape[1]
    grid = (n_pad // row_tile,)
    flops = 2 * n_pad * f_in * f_out_pad
    bytes_accessed = (
        n_pad * f_in * np.dtype(x_in.dtype).itemsize
        + f_in * f_out_pad * np.dtype(w_in.dtype).itemsize
        + n_pad * f_out_pad * np.dtype(out_dtype).itemsize
    )
    return pl.pallas_call(
        functools.partial(_support_kernel, precision=precision),
        out_shape=jax.ShapeDtypeStruct((n_pad, f_out_pad), out_dtype),
        grid_spec=pltpu.PrefetchScalarGridSpec(
            num_scalar_prefetch=0,
            grid=grid,
            in_specs=[
                pl.BlockSpec((row_tile, f_in), lambda i: (i, 0)),   # X row tile
                pl.BlockSpec((f_in, f_out_pad), lambda i: (0, 0)),  # full W (resident)
            ],
            out_specs=pl.BlockSpec((row_tile, f_out_pad), lambda i: (i, 0)),
        ),
        compiler_params=pltpu.CompilerParams(
            dimension_semantics=("parallel",),
            vmem_limit_bytes=vmem_limit,
        ),
        cost_estimate=pl.CostEstimate(
            flops=flops, transcendentals=0, bytes_accessed=bytes_accessed),
    )(x_in, w_in)


# ------------------ Stage 2: out = adj @ support + bias (K-tiled) -----------

def _aggregate_kernel(adj_ref, s_ref, b_ref, o_ref, *scratch,
                      k_tile, support_resident, acc_into_out, precision):
    k = pl.program_id(1)
    acc_ref = o_ref if acc_into_out else scratch[0]

    @pl.when(k == 0)
    def _():
        # Fold the bias into the accumulator init: no separate finalize pass
        # is needed on the f32 fast path.
        acc_ref[...] = jnp.zeros_like(acc_ref) + b_ref[...].astype(acc_ref.dtype)

    if support_resident:
        # Whole support array is a single VMEM-resident block; slice the
        # current K chunk out of it (no HBM re-read per row tile).
        start = pl.multiple_of(k * k_tile, k_tile)
        s = s_ref[pl.ds(start, k_tile), :]
    else:
        s = s_ref[...]

    acc_ref[...] += jnp.dot(
        adj_ref[...], s,
        preferred_element_type=jnp.float32,
        precision=precision,
    ).astype(acc_ref.dtype)

    if not acc_into_out:
        @pl.when(k == pl.num_programs(1) - 1)
        def _():
            o_ref[...] = acc_ref[...].astype(o_ref.dtype)


def gcn_forward(x, adj, weight, bias=None, *, max_tile=512,
                use_bf16_matmul=False, precision=None):
    """GraphConvolutionLayer.forward: adj @ (x @ weight) + bias.

    Tiles are chosen automatically (multiples of 128, up to `max_tile`) to
    minimize padding.  VMEM budget is set per generation (~48 MiB on v7x's
    64 MiB physical VMEM, ~96 MiB on v5e/v6e's 128 MiB) and must cover
    2x adj tile + support (resident or 2x streamed tile) + output tile.

    use_bf16_matmul=True casts adj in the wrapper and stores `support` in
    bf16 (the X@W matmul itself still accumulates in f32); accumulation of
    adj@support is always f32.  Recommended on v5e.  Note the support
    quantization can compound on high-degree graphs; keep the default f32
    path when exact f32 GCN semantics matter, optionally with
    precision=jax.lax.Precision.HIGHEST.
    """
    n, f_in = x.shape
    f_out = weight.shape[1]
    assert adj.shape == (n, n)

    out_dtype = x.dtype
    matmul_dtype = jnp.bfloat16 if use_bf16_matmul else jnp.float32
    vmem_limit = _vmem_limit_bytes()

    f_out_pad = _round_up(f_out, _LANE)           # lane-dense output features
    tile = _pick_tile(n, max_tile)                # row tile == k tile
    n_pad = _round_up(n, tile)                    # rows and contraction dim

    if bias is None:
        bias = jnp.zeros((f_out,), jnp.float32)

    # ---- operand prep: pad / cast only when actually required --------------
    if n_pad != n:
        x_in = jnp.zeros((n_pad, f_in), x.dtype).at[:n, :].set(x)
    else:
        x_in = x
    if f_out_pad != f_out:
        w_in = jnp.zeros((f_in, f_out_pad), weight.dtype).at[:, :f_out].set(weight)
    else:
        w_in = weight
    b_in = jnp.zeros((1, f_out_pad), jnp.float32).at[0, :f_out].set(
        bias.astype(jnp.float32))
    if n_pad != n:
        # Pad and (bf16 path) cast in one fused copy, written at target width.
        adj_in = (jnp.zeros((n_pad, n_pad), matmul_dtype)
                  .at[:n, :n].set(adj.astype(matmul_dtype)))
    elif adj.dtype != np.dtype(matmul_dtype):
        adj_in = adj.astype(matmul_dtype)
    else:
        adj_in = adj                              # no extra N^2 HBM round-trip

    # ---- stage 1: support = X @ W, emitted directly in the matmul dtype ----
    support = _compute_support(
        x_in, w_in, row_tile=tile, out_dtype=matmul_dtype,
        vmem_limit=vmem_limit, precision=precision)

    # ---- stage 2: out = adj @ support + bias --------------------------------
    s_item = np.dtype(matmul_dtype).itemsize
    adj_item = np.dtype(matmul_dtype).itemsize
    out_item = np.dtype(out_dtype).itemsize

    support_bytes = n_pad * f_out_pad * s_item
    # Resident when it (double-buffered) stays a small fraction of the budget.
    support_resident = support_bytes <= vmem_limit // 6
    # f32 outputs accumulate directly into the VMEM-resident output block.
    acc_into_out = np.dtype(out_dtype) == np.dtype(jnp.float32)

    grid = (n_pad // tile, n_pad // tile)
    grid_i = grid[0]

    if support_resident:
        s_spec = pl.BlockSpec((n_pad, f_out_pad), lambda i, k: (0, 0))
        support_read_bytes = support_bytes
    else:
        s_spec = pl.BlockSpec((tile, f_out_pad), lambda i, k: (k, 0))
        support_read_bytes = grid_i * support_bytes   # re-read once per row tile

    in_specs = [
        pl.BlockSpec((tile, tile), lambda i, k: (i, k)),      # adj
        s_spec,                                               # support
        pl.BlockSpec((1, f_out_pad), lambda i, k: (0, 0)),    # bias (resident)
    ]
    scratch_shapes = []
    if not acc_into_out:
        scratch_shapes.append(pltpu.VMEM((tile, f_out_pad), jnp.float32))

    flops = 2 * n_pad * n_pad * f_out_pad
    bytes_accessed = (n_pad * n_pad * adj_item
                      + support_read_bytes
                      + n_pad * f_out_pad * out_item
                      + f_out_pad * 4)

    out_pad = pl.pallas_call(
        functools.partial(
            _aggregate_kernel, k_tile=tile,
            support_resident=support_resident, acc_into_out=acc_into_out,
            precision=precision),
        out_shape=jax.ShapeDtypeStruct((n_pad, f_out_pad), out_dtype),
        grid_spec=pltpu.PrefetchScalarGridSpec(
            num_scalar_prefetch=0,
            grid=grid,
            in_specs=in_specs,
            out_specs=pl.BlockSpec((tile, f_out_pad), lambda i, k: (i, 0)),
            scratch_shapes=scratch_shapes,
        ),
        compiler_params=pltpu.CompilerParams(
            dimension_semantics=("parallel", "arbitrary"),
            vmem_limit_bytes=vmem_limit,
        ),
        cost_estimate=pl.CostEstimate(
            flops=flops, transcendentals=0, bytes_accessed=bytes_accessed),
    )(adj_in, support, b_in)

    if n_pad != n or f_out_pad != f_out:
        return out_pad[:n, :f_out]
    return out_pad


# ----------------------------- reference & tests ----------------------------

def gcn_reference(x, adj, weight, bias):
    support = x @ weight
    return adj @ support + bias[None, :]


def _make_problem(key, n, f_in, f_out):
    k_x, k_adj, k_w, k_b = jax.random.split(key, 4)
    x = jax.random.normal(k_x, (n, f_in), dtype=jnp.float32)
    a = (jax.random.uniform(k_adj, (n, n)) > 0.9).astype(jnp.float32)
    adj = a + a.T + jnp.eye(n, dtype=jnp.float32)
    adj = adj / jnp.sum(adj, axis=1, keepdims=True)
    # reset_parameters(): uniform(-stdv, stdv), stdv = 1/sqrt(out_features)
    stdv = 1.0 / math.sqrt(f_out)
    weight = jax.random.uniform(k_w, (f_in, f_out), minval=-stdv, maxval=stdv,
                                dtype=jnp.float32)
    bias = jax.random.uniform(k_b, (f_out,), minval=-stdv, maxval=stdv,
                              dtype=jnp.float32)
    return x, adj, weight, bias


if __name__ == "__main__":
    key = jax.random.PRNGKey(0)
    k1, k2 = jax.random.split(key)

    # Case 1: tile-aligned shapes (128 nodes, 64 -> 32 features), f32 path
    # (adj passed through untouched, direct accumulation into the output).
    N, F_IN, F_OUT = 128, 64, 32
    x, adj, weight, bias = _make_problem(k1, N, F_IN, F_OUT)
    ref = gcn_reference(x, adj, weight, bias)

    out = jax.block_until_ready(gcn_forward(x, adj, weight, bias))
    assert out.shape == (N, F_OUT)
    assert jnp.allclose(out, ref, atol=1e-4, rtol=1e-4)

    # Same shapes, bf16-operand / f32-accumulate MXU path (cast in wrapper,
    # support stored bf16).
    out_bf16 = jax.block_until_ready(
        gcn_forward(x, adj, weight, bias, use_bf16_matmul=True))
    assert jnp.allclose(out_bf16, ref, atol=5e-2, rtol=5e-2)

    # Case 2: N not a multiple of the tiles (fused pad path).
    N2, F_IN2, F_OUT2 = 100, 48, 20
    x2, adj2, weight2, bias2 = _make_problem(k2, N2, F_IN2, F_OUT2)
    out2 = jax.block_until_ready(gcn_forward(x2, adj2, weight2, bias2))
    ref2 = gcn_reference(x2, adj2, weight2, bias2)
    assert out2.shape == (N2, F_OUT2)
    assert jnp.allclose(out2, ref2, atol=1e-4, rtol=1e-4)

    print("KERNEL_OK")
</pallas_src>

<mosaic_0001>
module attributes {stable_mosaic.version = 11 : i64} {
  func.func @_support_kernel(%arg0: i32, %arg1: memref<128x64xf32, #tpu.memory_space<vmem>>, %arg2: memref<64x128xf32, #tpu.memory_space<vmem>>, %arg3: memref<128x128xf32, #tpu.memory_space<vmem>>) attributes {dimension_semantics = [#tpu.dimension_semantics<parallel>], iteration_bounds = array<i64: 1>, scalar_prefetch = 0 : i64, scratch_operands = 0 : i64, tpu.core_type = #tpu.core_type<tc>, window_params = [{transform_indices = @transform_0, window_bounds = array<i64: 128, 64>}, {pipeline_mode = #tpu.pipeline_mode<synchronous>, transform_indices = @transform_1, window_bounds = array<i64: 64, 128>}, {transform_indices = @transform_2, window_bounds = array<i64: 128, 128>}]} {
    %c0 = arith.constant 0 : index
    %c0_0 = arith.constant 0 : index
    %0 = vector.load %arg1[%c0, %c0_0] : memref<128x64xf32, #tpu.memory_space<vmem>>, vector<128x64xf32>
    %c0_1 = arith.constant 0 : index
    %c0_2 = arith.constant 0 : index
    %1 = vector.load %arg2[%c0_1, %c0_2] : memref<64x128xf32, #tpu.memory_space<vmem>>, vector<64x128xf32>
    %cst = arith.constant dense<0.000000e+00> : vector<128x128xf32>
    %2 = tpu.matmul %0, %1, %cst {dimension_numbers = #tpu.dot_dimension_numbers<[1], [0], [0], [1], [0, 0, 1, 1], [], []>} : vector<128x64xf32>, vector<64x128xf32>, vector<128x128xf32> -> vector<128x128xf32>
    %c0_3 = arith.constant 0 : index
    %c0_4 = arith.constant 0 : index
    %3 = vector.load %arg3[%c0_3, %c0_4] : memref<128x128xf32, #tpu.memory_space<vmem>>, vector<128x128xf32>
    tpu.vector_store %arg3[%c0_3, %c0_4], %2 {strides = array<i32>} : memref<128x128xf32, #tpu.memory_space<vmem>>, vector<128x128xf32>,
    return
  }
  func.func @transform_0(%arg0: i32) -> (i32, i32) {
    %c0_i32 = arith.constant 0 : i32
    %c0_i32_0 = arith.constant 0 : i32
    return %arg0, %c0_i32 : i32, i32
  }
  func.func @transform_1(%arg0: i32) -> (i32, i32) {
    %c0_i32 = arith.constant 0 : i32
    %c0_i32_0 = arith.constant 0 : i32
    %c0_i32_1 = arith.constant 0 : i32
    return %c0_i32, %c0_i32_0 : i32, i32
  }
  func.func @transform_2(%arg0: i32) -> (i32, i32) {
    %c0_i32 = arith.constant 0 : i32
    %c0_i32_0 = arith.constant 0 : i32
    return %arg0, %c0_i32 : i32, i32
  }
}

</mosaic_0001>

<bundles_post_ra>
// kernel: tpu_custom_call.1
= control target key start
LH: loop header
LB: loop body
LE: loop exit
PB: predicated region body
PF: predicated region fallthrough
CT: control target
= control target key end

     0   :  { %s492_s0 = inlined_call_operand.vmem [shape: f32[128,64], index: 0, kind: input, shape index: {}]   ;;  %s493_s1 = inlined_call_operand.vmem [shape: f32[64,128], index: 1, kind: input, shape index: {}]   ;;  %s494_s2 = inlined_call_operand.hbm [shape: f32[128,128], index: 2, kind: output, shape index: {}]  }
   0x1   :  { %v35_v0 = vld [vmem:[%s493_s1 + $0x38] sm:$0xff]  ;;  %v34_v1 = vld [vmem:[%s493_s1 + $0x30] sm:$0xff]  ;;  %v33_v2 = vld [vmem:[%s493_s1 + $0x28] sm:$0xff] }
   0x2   :  { %302 = vmatprep.subr.mxu0 %v35_v0  ;;  %342 = vmatprep.subr.mxu1 %v35_v0  ;;  %v32_v3 = vld [vmem:[%s493_s1 + $0x20] sm:$0xff]  ;;  %v31_v4 = vld [vmem:[%s493_s1 + $0x18] sm:$0xff]  ;;  %v30_v5 = vld [vmem:[%s493_s1 + $0x10] sm:$0xff] }
   0x3   :  { %303 = vmatpush3.msra.mxu0 %v35_v0  ;;  %350 = vmatpush3.msra.mxu1 %v35_v0 }
   0x4   :  { %304 = vmatprep.subr.mxu0 %v34_v1  ;;  %343 = vmatprep.subr.mxu1 %v34_v1 }
   0x5   :  { %305 = vmatpush3.msra.mxu0 %v34_v1  ;;  %351 = vmatpush3.msra.mxu1 %v34_v1 }
   0x6   :  { %306 = vmatprep.subr.mxu0 %v33_v2  ;;  %344 = vmatprep.subr.mxu1 %v33_v2 }
   0x7   :  { %307 = vmatpush3.msra.mxu0 %v33_v2  ;;  %352 = vmatpush3.msra.mxu1 %v33_v2 }
   0x8   :  { %308 = vmatprep.subr.mxu0 %v32_v3  ;;  %345 = vmatprep.subr.mxu1 %v32_v3 }
   0x9   :  { %309 = vmatpush3.msra.mxu0 %v32_v3  ;;  %353 = vmatpush3.msra.mxu1 %v32_v3 }
   0xa   :  { %7 = vsyncpa [#allocation3], 0  ;;  %310 = vmatprep.subr.mxu0 %v31_v4  ;;  %346 = vmatprep.subr.mxu1 %v31_v4  ;;  %v29_v6 = vld [vmem:[%s493_s1 + $0x8] sm:$0xff]  ;;  %v28_v7 = vld [vmem:[%s493_s1] sm:$0xff]  ;;  %vm36_vm0 = vcmask 523264  }
   0xb   :  { %311 = vmatpush3.msra.mxu0 %v31_v4  ;;  %354 = vmatpush3.msra.mxu1 %v31_v4  ;;  %v12_v8 = vld [vmem:[%s492_s0] sm:$0xff]  ;;  %v13_v10 = vld [vmem:[%s492_s0 + $0x8] sm:$0xff]  ;;  %v14_v12 = vld [vmem:[%s492_s0 + $0x10] sm:$0xff] }
   0xc   :  { %312 = vmatprep.subr.mxu0 %v30_v5  ;;  %347 = vmatprep.subr.mxu1 %v30_v5  ;;  %v20_v9 = vld [vmem:[%s492_s0 + $0x40] sm:$0xff]  ;;  %v21_v11 = vld [vmem:[%s492_s0 + $0x48] sm:$0xff]  ;;  %v22_v13 = vld [vmem:[%s492_s0 + $0x50] sm:$0xff] }
   0xd   :  { %313 = vmatpush3.msra.mxu0 %v30_v5  ;;  %355 = vmatpush3.msra.mxu1 %v30_v5  ;;  %v15_v14 = vld [vmem:[%s492_s0 + $0x18] sm:$0xff]  ;;  %v16_v16 = vld [vmem:[%s492_s0 + $0x20] sm:$0xff]  ;;  %v17_v18 = vld [vmem:[%s492_s0 + $0x28] sm:$0xff] }
   0xe   :  { %314 = vmatprep.subr.mxu0 %v29_v6  ;;  %348 = vmatprep.subr.mxu1 %v29_v6  ;;  %v23_v15 = vld [vmem:[%s492_s0 + $0x58] sm:$0xff]  ;;  %v24_v17 = vld [vmem:[%s492_s0 + $0x60] sm:$0xff]  ;;  %v25_v19 = vld [vmem:[%s492_s0 + $0x68] sm:$0xff] }
   0xf   :  { %315 = vmatpush3.msra.mxu0 %v29_v6  ;;  %356 = vmatpush3.msra.mxu1 %v29_v6  ;;  %v18_v20 = vld [vmem:[%s492_s0 + $0x30] sm:$0xff]  ;;  %v19_v22 = vld [vmem:[%s492_s0 + $0x38] sm:$0xff] }
  0x10   :  { %316 = vmatprep.subr.mxu0 %v28_v7  ;;  %349 = vmatprep.subr.mxu1 %v28_v7  ;;  %v26_v21 = vld [vmem:[%s492_s0 + $0x70] sm:$0xff]  ;;  %v27_v23 = vld [vmem:[%s492_s0 + $0x78] sm:$0xff]  ;;  %s383_s0 = smov [#allocation2]  }
  0x11   :  { %317 = vmatpush3.msra.mxu0 %v28_v7  ;;  %357 = vmatpush3.msra.mxu1 %v28_v7  ;;  %s251_s28 = sshll.u32 %s383_s0, 4  ;;  %s252_s28 = int_to_ptr.vmem [resolvable:$true] %s251_s28 }
  0x12   :  { %318 = vmatprep.mubr.msk.f32.mxu0 %vm36_vm0, %v12_v8  ;;  %330 = vmatprep.mubr.msk.f32.mxu1 %vm36_vm0, %v20_v9  ;;  %s361_s29 = scalar_lea.vmem %s252_s28, 2048  ;;  %p366_p1 = scmp.lt.s32.totalorder %s252_s28, %s252_s28 }
  0x13   :  { %319 = vmatmul.mubr.msk.f32.vlgmr.msra.gmra.mxu0 %vm36_vm0, %v13_v10  ;;  %331 = vmatmul.mubr.msk.f32.vlgmr.msra.gmra.mxu1 %vm36_vm0, %v21_v11  ;;  %p362_p0 = scmp.ne.s32.totalorder %s252_s28, %s361_s29  ;;  %p367_p2 = scmp.lt.s32.totalorder %s361_s29, %s361_s29 }
  0x14   :  { %321 = vmatprep.mubr.msk.f32.mxu0 %vm36_vm0, %v14_v12  ;;  %333 = vmatprep.mubr.msk.f32.mxu1 %vm36_vm0, %v22_v13 }
  0x15   :  { %p368_p3 = por %p367_p2, %p366_p1 }
  0x17   :  { %322 = vmatmul.mubr.msk.f32.gmra.mxu0 %vm36_vm0, %v15_v14  ;;  %334 = vmatmul.mubr.msk.f32.gmra.mxu1 %vm36_vm0, %v23_v15  ;;  %p369_p4 = pnand %p368_p3, %p362_p0 }
  0x18   :  { %324 = vmatprep.mubr.msk.f32.mxu0 %vm36_vm0, %v16_v16  ;;  %336 = vmatprep.mubr.msk.f32.mxu1 %vm36_vm0, %v24_v17 }
  0x1b   :  { %325 = vmatmul.mubr.msk.f32.gmra.mxu0 %vm36_vm0, %v17_v18  ;;  %337 = vmatmul.mubr.msk.f32.gmra.mxu1 %vm36_vm0, %v25_v19 }
  0x1c   :  { %327 = vmatprep.mubr.msk.f32.mxu0 %vm36_vm0, %v18_v20  ;;  %339 = vmatprep.mubr.msk.f32.mxu1 %vm36_vm0, %v26_v21 }
  0x1f   :  { %328 = vmatmul.mubr.msk.f32.gmra.mxu0 %vm36_vm0, %v19_v22  ;;  %340 = vmatmul.mubr.msk.f32.gmra.mxu1 %vm36_vm0, %v27_v23 }
  0xd3   :  { %v320_v24 = vpop.f32.mrf.mxu0  ;;  %v332_v25 = vpop.f32.mrf.mxu1 }
  0xd4   :  { %231 = vst [vmem:[#allocation2 + $0x8] sm:$0xff] %v320_v24  ;;  %239 = vst [vmem:[#allocation2 + $0x48] sm:$0xff] %v332_v25 }
  0xd5   :  { %v151_v26 = vpop.f32.mrf.mxu0  ;;  %v191_v27 = vpop.f32.mrf.mxu1 }
  0xd6   :  { %230 = vst [vmem:[#allocation2] sm:$0xff] %v151_v26  ;;  %238 = vst [vmem:[#allocation2 + $0x40] sm:$0xff] %v191_v27 }
  0xd7   :  { %v323_v28 = vpop.f32.mrf.mxu0  ;;  %v335_v29 = vpop.f32.mrf.mxu1 }
  0xd8   :  { %233 = vst [vmem:[#allocation2 + $0x18] sm:$0xff] %v323_v28  ;;  %241 = vst [vmem:[#allocation2 + $0x58] sm:$0xff] %v335_v29 }
  0xd9   :  { %v161_v30 = vpop.f32.mrf.mxu0  ;;  %v201_v31 = vpop.f32.mrf.mxu1 }
  0xda   :  { %232 = vst [vmem:[#allocation2 + $0x10] sm:$0xff] %v161_v30  ;;  %240 = vst [vmem:[#allocation2 + $0x50] sm:$0xff] %v201_v31 }
  0xdb   :  { %v326_v32 = vpop.f32.mrf.mxu0  ;;  %v338_v33 = vpop.f32.mrf.mxu1 }
  0xdc   :  { %235 = vst [vmem:[#allocation2 + $0x28] sm:$0xff] %v326_v32  ;;  %243 = vst [vmem:[#allocation2 + $0x68] sm:$0xff] %v338_v33 }
  0xdd   :  { %v171_v34 = vpop.f32.mrf.mxu0  ;;  %v211_v35 = vpop.f32.mrf.mxu1 }
  0xde   :  { %234 = vst [vmem:[#allocation2 + $0x20] sm:$0xff] %v171_v34  ;;  %242 = vst [vmem:[#allocation2 + $0x60] sm:$0xff] %v211_v35 }
  0xdf   :  { %v329_v36 = vpop.f32.mrf.mxu0  ;;  %v341_v37 = vpop.f32.mrf.mxu1 }
  0xe0   :  { %237 = vst [vmem:[#allocation2 + $0x38] sm:$0xff] %v329_v36  ;;  %245 = vst [vmem:[#allocation2 + $0x78] sm:$0xff] %v341_v37 }
  0xe1   :  { %v181_v38 = vpop.f32.mrf.mxu0  ;;  %v221_v39 = vpop.f32.mrf.mxu1 }
  0xe2   :  { %236 = vst [vmem:[#allocation2 + $0x30] sm:$0xff] %v181_v38  ;;  %244 = vst [vmem:[#allocation2 + $0x70] sm:$0xff] %v221_v39 }
  0xe3   :  { %372 = shalt.err (!%p369_p4)
}
  0xe4   :  { %s384_s30 = smov 128   ;;  %s385_s1 = smov 8  }
  0xe5   :  { %257 = dma.vmem_to_hbm [thread:$0]  %s252_s28, 2048, %s494_s2, [#allocation3], %s384_s30, %s384_s30, %s385_s1  }
  0xe6   :  { %381 = dma.done.wait [#allocation3], 2048  }
  0xe7   :  { %382 = vsyncadd [#allocation3], 4294965248 }
  0xe8   :  { %261 = vsyncpa [#allocation3], 1 }

</bundles_post_ra>
